<compile_context>
chip_gen: v5e
topology: v5e:2x2
jax: 0.10.0
libtpu: 0.0.40
codegen_flags: <defaults>
</compile_context>

<pallas_src>
import functools
import math

import jax
import jax.numpy as jnp
from jax.experimental import pallas as pl
from jax.experimental.pallas import tpu as pltpu


def _round_up(n, m):
    return ((n + m - 1) // m) * m


def _ncnv1_kernel(xl_ref, xr_ref, wb_ref, bb_ref, wcl_ref, wcr_ref, bc_ref,
                  out_ref):
    # xl_ref / xr_ref : (TB, D)   f32 flattened input tiles (one per tower)
    # wb_ref          : (D, Fp)   bf16 backbone weight (transposed, col-padded)
    # bb_ref          : (1, Fp)   f32 backbone bias
    # wcl_ref/wcr_ref : (Fp, Op)  bf16 classifier weight halves (rows [:F]/[F:])
    # bc_ref          : (1, Op)   f32 classifier bias
    # out_ref         : (TB, Op)  f32 output tile
    tb = xl_ref.shape[0]

    # Cast each tower tile to bf16 and stack along the sublane (batch) axis.
    # The cast has to materialize bf16 data anyway (inputs arrive as f32), so
    # the stack adds no extra copy and buys a single MXU weight push for the
    # shared backbone weight: one (2*TB, D) x (D, Fp) pass instead of two.
    x2 = jnp.concatenate(
        [xl_ref[...].astype(jnp.bfloat16), xr_ref[...].astype(jnp.bfloat16)],
        axis=0)                                                    # (2*TB, D)

    feats = jnp.dot(x2, wb_ref[...], preferred_element_type=jnp.float32)
    feats = jnp.maximum(feats + bb_ref[...], 0.0)                  # f32 bias+ReLU

    # Intentional bf16 re-quantization of activations before the classifier.
    feat_l = feats[:tb].astype(jnp.bfloat16)
    feat_r = feats[tb:].astype(jnp.bfloat16)

    # torch.cat((left, right), dim=1) folded into two accumulating dots.
    acc = jnp.dot(feat_l, wcl_ref[...], preferred_element_type=jnp.float32)
    acc = acc + jnp.dot(feat_r, wcr_ref[...], preferred_element_type=jnp.float32)
    out_ref[...] = acc + bc_ref[...]


@functools.partial(jax.jit, static_argnames=("tile_b",))
def ncnv1_forward(x_left, x_right, wb, bb, wc, bc, *, tile_b=256):
    """NCNV1 forward (eval mode).

    Args (weights in native PyTorch nn.Linear layout):
      x_left, x_right: (B, ...) input pair; flattened to (B, D) per tower.
      wb: (F, D)  backbone Linear weight,   bb: (F,)  backbone bias.
      wc: (O, 2F) classifier Linear weight, bc: (O,)  classifier bias.
      tile_b: max batch-tile size (auto-shrunk to fit the VMEM budget).
    """
    B = x_left.shape[0]
    D = math.prod(x_left.shape[1:])
    F = wb.shape[0]
    O = wc.shape[0]

    # Lane-pad the feature / output dims -> full MXU columns, lane-dense stores.
    Fp = _round_up(F, 128)
    Op = _round_up(O, 128)

    # Batch tile: multiple of 16 (bf16 sublane packing); partial last block is
    # handled by Pallas (clipped DMAs), so the batch is NOT padded in HBM.
    TB = max(16, (min(tile_b, _round_up(B, 16)) // 16) * 16)
    # v7x: prefer >= 2 grid steps when the batch allows, so the "parallel"
    # batch axis gives both TensorCores work (harmless on v5e / v6e).
    if -(-B // TB) == 1 and B > 16:
        TB = _round_up(-(-B // 2), 16)

    def vmem_bytes(tb):
        x_tiles = 2 * (2 * tb * D * 4)                   # 2 towers, double-buffered f32 tiles
        residents = (D * Fp + 2 * Fp * Op) * 2 + (Fp + Op) * 4  # single-buffered weights/biases
        out_tiles = 2 * (tb * Op * 4)                    # double-buffered f32 output tile
        temps = 2 * tb * D * 2 + 2 * tb * Fp * 4         # stacked bf16 lhs + f32 feats
        return x_tiles + residents + out_tiles + temps

    # Conservative working-set budget that also fits v7x's 64 MiB physical VMEM.
    VMEM_BUDGET = 24 * 1024 * 1024
    while vmem_bytes(TB) > VMEM_BUDGET and TB > 16:
        TB = max(16, ((TB // 2) // 16) * 16)

    nb = -(-B // TB)                                     # cdiv; last block may be partial

    # One-time, tiny weight prep: transpose to (in, out), zero-pad, cast bf16.
    wb_t = jnp.pad(wb.T, ((0, 0), (0, Fp - F))).astype(jnp.bfloat16)           # (D, Fp)
    bb_p = jnp.pad(bb.reshape(1, F), ((0, 0), (0, Fp - F))).astype(jnp.float32)
    wc_t = wc.T                                                                  # (2F, O)
    wcl = jnp.pad(wc_t[:F], ((0, Fp - F), (0, Op - O))).astype(jnp.bfloat16)    # (Fp, Op)
    wcr = jnp.pad(wc_t[F:], ((0, Fp - F), (0, Op - O))).astype(jnp.bfloat16)    # (Fp, Op)
    bc_p = jnp.pad(bc.reshape(1, O), ((0, 0), (0, Op - O))).astype(jnp.float32)

    # Raw f32 inputs, flattened only (free reshape) — no pad/cast prep pass.
    xl = x_left.reshape(B, D)
    xr = x_right.reshape(B, D)

    # Whole-array VMEM residency: copied in once, NOT double-buffered.
    def resident():
        return pl.BlockSpec(memory_space=pltpu.MemorySpace.VMEM)

    flops = 2 * (2 * B) * D * Fp + 2 * (2 * B) * Fp * Op
    bytes_accessed = (2 * B * D * 4                       # x (f32, streamed once)
                      + (D * Fp + 2 * Fp * Op) * 2        # bf16 weights
                      + (Fp + Op) * 4                     # f32 biases
                      + B * Op * 4)                       # f32 output

    out_p = pl.pallas_call(
        _ncnv1_kernel,
        out_shape=jax.ShapeDtypeStruct((B, Op), jnp.float32),
        grid_spec=pltpu.PrefetchScalarGridSpec(
            num_scalar_prefetch=0,
            grid=(nb,),
            in_specs=[
                pl.BlockSpec((TB, D), lambda i: (i, 0)),   # x_left tile (f32)
                pl.BlockSpec((TB, D), lambda i: (i, 0)),   # x_right tile (f32)
                resident(),                                # wb  (VMEM-resident)
                resident(),                                # bb
                resident(),                                # wc top half
                resident(),                                # wc bottom half
                resident(),                                # bc
            ],
            out_specs=pl.BlockSpec((TB, Op), lambda i: (i, 0)),
        ),
        compiler_params=pltpu.CompilerParams(
            dimension_semantics=("parallel",),             # shard batch across v7x TCs
            vmem_limit_bytes=int(min(64 * 1024 * 1024,
                                     max(32 * 1024 * 1024, 2 * vmem_bytes(TB)))),
        ),
        cost_estimate=pl.CostEstimate(
            flops=flops, transcendentals=0, bytes_accessed=bytes_accessed),
    )(xl, xr, wb_t, bb_p, wcl, wcr, bc_p)

    return out_p[:, :O]


def init_params(key, in_dim, feat_dim, out_dim):
    """PyTorch-style nn.Linear init, in native PyTorch (out, in) layout."""
    k1, k2, k3, k4 = jax.random.split(key, 4)
    b1 = 1.0 / math.sqrt(in_dim)
    b2 = 1.0 / math.sqrt(2 * feat_dim)
    wb = jax.random.uniform(k1, (feat_dim, in_dim), jnp.float32, -b1, b1)
    bb = jax.random.uniform(k2, (feat_dim,), jnp.float32, -b1, b1)
    wc = jax.random.uniform(k3, (out_dim, 2 * feat_dim), jnp.float32, -b2, b2)
    bc = jax.random.uniform(k4, (out_dim,), jnp.float32, -b2, b2)
    return wb, bb, wc, bc


def ncnv1_reference(x_left, x_right, wb, bb, wc, bc):
    """Plain-JAX f32 reference mirroring the PyTorch forward (eval mode)."""
    B = x_left.shape[0]
    xl = x_left.reshape(B, -1)
    xr = x_right.reshape(B, -1)
    fl = jnp.maximum(xl @ wb.T + bb, 0.0)
    fr = jnp.maximum(xr @ wb.T + bb, 0.0)
    return jnp.concatenate([fl, fr], axis=-1) @ wc.T + bc


def ncnv1_reference_bf16(x_left, x_right, wb, bb, wc, bc):
    """Reference mimicking the kernel's bf16-input / f32-accumulate numerics."""
    q = lambda a: a.astype(jnp.bfloat16).astype(jnp.float32)
    B = x_left.shape[0]
    xl = q(x_left.reshape(B, -1))
    xr = q(x_right.reshape(B, -1))
    wbq, wcq = q(wb), q(wc)
    fl = q(jnp.maximum(xl @ wbq.T + bb, 0.0))
    fr = q(jnp.maximum(xr @ wbq.T + bb, 0.0))
    return jnp.concatenate([fl, fr], axis=-1) @ wcq.T + bc


if __name__ == "__main__":
    # Small shapes: batch=2, channels=4, spatial=16x16 (backbone modeled as
    # Flatten -> Linear(1024, 32) -> ReLU), classifier_in_shape=32, out=8.
    B, C, H, W = 2, 4, 16, 16
    FEAT, OUT = 32, 8

    key = jax.random.PRNGKey(0)
    k_xl, k_xr, k_p = jax.random.split(key, 3)
    x_left = jax.random.normal(k_xl, (B, C, H, W), jnp.float32)
    x_right = jax.random.normal(k_xr, (B, C, H, W), jnp.float32)
    wb, bb, wc, bc = init_params(k_p, C * H * W, FEAT, OUT)

    out = jax.block_until_ready(ncnv1_forward(x_left, x_right, wb, bb, wc, bc))
    assert out.shape == (B, OUT), out.shape

    ref_q = ncnv1_reference_bf16(x_left, x_right, wb, bb, wc, bc)
    ref_f = ncnv1_reference(x_left, x_right, wb, bb, wc, bc)
    # Tight check against a reference with matching bf16 quantization.
    assert jnp.allclose(out, ref_q, atol=1e-2, rtol=1e-2), "mismatch vs bf16 ref"
    # Loose check against the exact f32 PyTorch-eval semantics.
    assert jnp.allclose(out, ref_f, atol=5e-2, rtol=5e-2), "mismatch vs f32 ref"

    print("KERNEL_OK")
</pallas_src>

<mosaic_0001>
module attributes {stable_mosaic.version = 11 : i64} {
  func.func @_ncnv1_kernel(%arg0: i32, %arg1: memref<16x1024xf32, #tpu.memory_space<vmem>>, %arg2: memref<16x1024xf32, #tpu.memory_space<vmem>>, %arg3: memref<1024x128xbf16, #tpu.memory_space<vmem>>, %arg4: memref<1x128xf32, #tpu.memory_space<vmem>>, %arg5: memref<128x128xbf16, #tpu.memory_space<vmem>>, %arg6: memref<128x128xbf16, #tpu.memory_space<vmem>>, %arg7: memref<1x128xf32, #tpu.memory_space<vmem>>, %arg8: memref<16x128xf32, #tpu.memory_space<vmem>>) attributes {dimension_semantics = [#tpu.dimension_semantics<parallel>], iteration_bounds = array<i64: 1>, scalar_prefetch = 0 : i64, scratch_operands = 0 : i64, tpu.core_type = #tpu.core_type<tc>, window_params = [{transform_indices = @transform_0, window_bounds = array<i64: 16, 1024>}, {transform_indices = @transform_1, window_bounds = array<i64: 16, 1024>}, {pipeline_mode = #tpu.pipeline_mode<synchronous>, transform_indices = @transform_2, window_bounds = array<i64: 1024, 128>}, {pipeline_mode = #tpu.pipeline_mode<synchronous>, transform_indices = @transform_3, window_bounds = array<i64: 1, 128>}, {pipeline_mode = #tpu.pipeline_mode<synchronous>, transform_indices = @transform_4, window_bounds = array<i64: 128, 128>}, {pipeline_mode = #tpu.pipeline_mode<synchronous>, transform_indices = @transform_5, window_bounds = array<i64: 128, 128>}, {pipeline_mode = #tpu.pipeline_mode<synchronous>, transform_indices = @transform_6, window_bounds = array<i64: 1, 128>}, {transform_indices = @transform_7, window_bounds = array<i64: 16, 128>}]} {
    %c0 = arith.constant 0 : index
    %c0_0 = arith.constant 0 : index
    %0 = vector.load %arg1[%c0, %c0_0] : memref<16x1024xf32, #tpu.memory_space<vmem>>, vector<16x1024xf32>
    %1 = arith.truncf %0 : vector<16x1024xf32> to vector<16x1024xbf16>
    %c0_1 = arith.constant 0 : index
    %c0_2 = arith.constant 0 : index
    %2 = vector.load %arg2[%c0_1, %c0_2] : memref<16x1024xf32, #tpu.memory_space<vmem>>, vector<16x1024xf32>
    %3 = arith.truncf %2 : vector<16x1024xf32> to vector<16x1024xbf16>
    %4 = tpu.concatenate %1, %3 in 0 : vector<16x1024xbf16>, vector<16x1024xbf16> -> vector<32x1024xbf16>
    %c0_3 = arith.constant 0 : index
    %c0_4 = arith.constant 0 : index
    %5 = vector.load %arg3[%c0_3, %c0_4] : memref<1024x128xbf16, #tpu.memory_space<vmem>>, vector<1024x128xbf16>
    %cst = arith.constant dense<0.000000e+00> : vector<32x128xf32>
    %6 = tpu.matmul %4, %5, %cst {dimension_numbers = #tpu.dot_dimension_numbers<[1], [0], [0], [1], [0, 0, 1, 1], [], []>} : vector<32x1024xbf16>, vector<1024x128xbf16>, vector<32x128xf32> -> vector<32x128xf32>
    %c0_5 = arith.constant 0 : index
    %c0_6 = arith.constant 0 : index
    %7 = vector.load %arg4[%c0_5, %c0_6] : memref<1x128xf32, #tpu.memory_space<vmem>>, vector<1x128xf32>
    %8 = vector.broadcast %7 : vector<1x128xf32> to vector<32x128xf32>
    %9 = arith.addf %6, %8 : vector<32x128xf32>
    %cst_7 = arith.constant 0.000000e+00 : f32
    %10 = vector.broadcast %cst_7 : f32 to vector<32x128xf32>
    %11 = arith.maximumf %9, %10 : vector<32x128xf32>
    %12 = vector.extract_strided_slice %11 {offsets = [0, 0], sizes = [16, 128], strides = [1, 1]} : vector<32x128xf32> to vector<16x128xf32>
    %13 = arith.truncf %12 : vector<16x128xf32> to vector<16x128xbf16>
    %14 = vector.extract_strided_slice %11 {offsets = [16, 0], sizes = [16, 128], strides = [1, 1]} : vector<32x128xf32> to vector<16x128xf32>
    %15 = arith.truncf %14 : vector<16x128xf32> to vector<16x128xbf16>
    %c0_8 = arith.constant 0 : index
    %c0_9 = arith.constant 0 : index
    %16 = vector.load %arg5[%c0_8, %c0_9] : memref<128x128xbf16, #tpu.memory_space<vmem>>, vector<128x128xbf16>
    %cst_10 = arith.constant dense<0.000000e+00> : vector<16x128xf32>
    %17 = tpu.matmul %13, %16, %cst_10 {dimension_numbers = #tpu.dot_dimension_numbers<[1], [0], [0], [1], [0, 0, 1, 1], [], []>} : vector<16x128xbf16>, vector<128x128xbf16>, vector<16x128xf32> -> vector<16x128xf32>
    %c0_11 = arith.constant 0 : index
    %c0_12 = arith.constant 0 : index
    %18 = vector.load %arg6[%c0_11, %c0_12] : memref<128x128xbf16, #tpu.memory_space<vmem>>, vector<128x128xbf16>
    %cst_13 = arith.constant dense<0.000000e+00> : vector<16x128xf32>
    %19 = tpu.matmul %15, %18, %cst_13 {dimension_numbers = #tpu.dot_dimension_numbers<[1], [0], [0], [1], [0, 0, 1, 1], [], []>} : vector<16x128xbf16>, vector<128x128xbf16>, vector<16x128xf32> -> vector<16x128xf32>
    %20 = arith.addf %17, %19 : vector<16x128xf32>
    %c0_14 = arith.constant 0 : index
    %c0_15 = arith.constant 0 : index
    %21 = vector.load %arg7[%c0_14, %c0_15] : memref<1x128xf32, #tpu.memory_space<vmem>>, vector<1x128xf32>
    %22 = vector.broadcast %21 : vector<1x128xf32> to vector<16x128xf32>
    %23 = arith.addf %20, %22 : vector<16x128xf32>
    %c0_16 = arith.constant 0 : index
    %c0_17 = arith.constant 0 : index
    %24 = vector.load %arg8[%c0_16, %c0_17] : memref<16x128xf32, #tpu.memory_space<vmem>>, vector<16x128xf32>
    tpu.vector_store %arg8[%c0_16, %c0_17], %23 {strides = array<i32>} : memref<16x128xf32, #tpu.memory_space<vmem>>, vector<16x128xf32>,
    return
  }
  func.func @transform_0(%arg0: i32) -> (i32, i32) {
    %c0_i32 = arith.constant 0 : i32
    %c0_i32_0 = arith.constant 0 : i32
    return %arg0, %c0_i32 : i32, i32
  }
  func.func @transform_1(%arg0: i32) -> (i32, i32) {
    %c0_i32 = arith.constant 0 : i32
    %c0_i32_0 = arith.constant 0 : i32
    return %arg0, %c0_i32 : i32, i32
  }
  func.func @transform_2(%arg0: i32) -> (i32, i32) {
    %c0_i32 = arith.constant 0 : i32
    %c0_i32_0 = arith.constant 0 : i32
    %c0_i32_1 = arith.constant 0 : i32
    return %c0_i32, %c0_i32_0 : i32, i32
  }
  func.func @transform_3(%arg0: i32) -> (i32, i32) {
    %c0_i32 = arith.constant 0 : i32
    %c0_i32_0 = arith.constant 0 : i32
    %c0_i32_1 = arith.constant 0 : i32
    return %c0_i32, %c0_i32_0 : i32, i32
  }
  func.func @transform_4(%arg0: i32) -> (i32, i32) {
    %c0_i32 = arith.constant 0 : i32
    %c0_i32_0 = arith.constant 0 : i32
    %c0_i32_1 = arith.constant 0 : i32
    return %c0_i32, %c0_i32_0 : i32, i32
  }
  func.func @transform_5(%arg0: i32) -> (i32, i32) {
    %c0_i32 = arith.constant 0 : i32
    %c0_i32_0 = arith.constant 0 : i32
    %c0_i32_1 = arith.constant 0 : i32
    return %c0_i32, %c0_i32_0 : i32, i32
  }
  func.func @transform_6(%arg0: i32) -> (i32, i32) {
    %c0_i32 = arith.constant 0 : i32
    %c0_i32_0 = arith.constant 0 : i32
    %c0_i32_1 = arith.constant 0 : i32
    return %c0_i32, %c0_i32_0 : i32, i32
  }
  func.func @transform_7(%arg0: i32) -> (i32, i32) {
    %c0_i32 = arith.constant 0 : i32
    %c0_i32_0 = arith.constant 0 : i32
    return %arg0, %c0_i32 : i32, i32
  }
}

</mosaic_0001>

<bundles_post_ra>
// kernel: ncnv1_forward.1
= control target key start
LH: loop header
LB: loop body
LE: loop exit
PB: predicated region body
PF: predicated region fallthrough
CT: control target
= control target key end

     0   :  { %12 = vsyncpa [#allocation3], 0  ;;  %s1984_s0 = inlined_call_operand.vmem [shape: f32[2,1024], index: 0, kind: input, shape index: {}]   ;;  %s1985_s1 = inlined_call_operand.vmem [shape: f32[2,1024], index: 1, kind: input, shape index: {}]   ;;  %s1986_s2 = inlined_call_operand.vmem [shape: bf16[1024,128], index: 2, kind: input, shape index: {}]   ;;  %s1987_s3 = inlined_call_operand.vmem [shape: f32[1,128], index: 3, kind: input, shape index: {}]   ;;  %s1988_s4 = inlined_call_operand.vmem [shape: bf16[128,128], index: 4, kind: input, shape index: {}]   ;;  %s1989_s5 = inlined_call_operand.vmem [shape: bf16[128,128], index: 5, kind: input, shape index: {}]   ;;  %s1990_s6 = inlined_call_operand.vmem [shape: f32[1,128], index: 6, kind: input, shape index: {}]   ;;  %s1991_s7 = inlined_call_operand.hbm [shape: f32[2,128], index: 7, kind: output, shape index: {}]  }
   0x1   :  { %v1480_v0 = vld [vmem:[%s1986_s2 + $0x38] sm:$0xff]  ;;  %v1479_v4 = vld [vmem:[%s1986_s2 + $0x30] sm:$0xff]  ;;  %v1478_v8 = vld [vmem:[%s1986_s2 + $0x28] sm:$0xff] }
   0x2   :  { %v1488_v1 = vld [vmem:[%s1986_s2 + $0x78] sm:$0xff]  ;;  %813 = vmatpush.bf16.msra.mxu0 %v1480_v0  ;;  %v1487_v5 = vld [vmem:[%s1986_s2 + $0x70] sm:$0xff]  ;;  %v1486_v9 = vld [vmem:[%s1986_s2 + $0x68] sm:$0xff] }
   0x3   :  { %v1496_v2 = vld [vmem:[%s1986_s2 + $0xb8] sm:$0xff]  ;;  %832 = vmatpush.bf16.msra.mxu1 %v1488_v1  ;;  %v1495_v6 = vld [vmem:[%s1986_s2 + $0xb0] sm:$0xff]  ;;  %v1494_v10 = vld [vmem:[%s1986_s2 + $0xa8] sm:$0xff] }
   0x4   :  { %v1504_v3 = vld [vmem:[%s1986_s2 + $0xf8] sm:$0xff]  ;;  %851 = vmatpush.bf16.msra.mxu2 %v1496_v2  ;;  %v1503_v7 = vld [vmem:[%s1986_s2 + $0xf0] sm:$0xff]  ;;  %v1502_v11 = vld [vmem:[%s1986_s2 + $0xe8] sm:$0xff] }
   0x5   :  { %870 = vmatpush.bf16.msra.mxu3 %v1504_v3  ;;  %v1477_v12 = vld [vmem:[%s1986_s2 + $0x20] sm:$0xff]  ;;  %v29_v17 = vld [vmem:[%s1984_s0 + $0x10] sm:$0xff]  ;;  %v1476_v20 = vld [vmem:[%s1986_s2 + $0x18] sm:$0xff] }
   0x6   :  { %814 = vmatpush.bf16.msra.mxu0 %v1479_v4  ;;  %v1485_v13 = vld [vmem:[%s1986_s2 + $0x60] sm:$0xff]  ;;  %v33_v19 = vld [vmem:[%s1984_s0 + $0x30] sm:$0xff]  ;;  %61 = vst [vmem:[#allocation1 + $0x1] ss:$4 sm:$0xff] %v29_v17  ;;  %v1484_v21 = vld [vmem:[%s1986_s2 + $0x58] sm:$0xff] }
   0x7   :  { %833 = vmatpush.bf16.msra.mxu1 %v1487_v5  ;;  %v1493_v14 = vld [vmem:[%s1986_s2 + $0xa0] sm:$0xff]  ;;  %v1492_v22 = vld [vmem:[%s1986_s2 + $0x98] sm:$0xff]  ;;  %65 = vst [vmem:[#allocation1 + $0x3] ss:$4 sm:$0xff] %v33_v19  ;;  %v1475_v24 = vld [vmem:[%s1986_s2 + $0x10] sm:$0xff] }
   0x8   :  { %852 = vmatpush.bf16.msra.mxu2 %v1495_v6  ;;  %v1501_v15 = vld [vmem:[%s1986_s2 + $0xe0] sm:$0xff]  ;;  %v1500_v23 = vld [vmem:[%s1986_s2 + $0xd8] sm:$0xff]  ;;  %v1483_v25 = vld [vmem:[%s1986_s2 + $0x50] sm:$0xff] }
   0x9   :  { %871 = vmatpush.bf16.msra.mxu3 %v1503_v7  ;;  %v27_v16 = vld [vmem:[%s1984_s0] sm:$0xff]  ;;  %v1491_v26 = vld [vmem:[%s1986_s2 + $0x90] sm:$0xff]  ;;  %v1474_v28 = vld [vmem:[%s1986_s2 + $0x8] sm:$0xff] }
   0xa   :  { %815 = vmatpush.bf16.msra.mxu0 %v1478_v8  ;;  %v31_v18 = vld [vmem:[%s1984_s0 + $0x20] sm:$0xff]  ;;  %59 = vst [vmem:[#allocation1] ss:$4 sm:$0xff] %v27_v16  ;;  %v1499_v27 = vld [vmem:[%s1986_s2 + $0xd0] sm:$0xff]  ;;  %v1482_v29 = vld [vmem:[%s1986_s2 + $0x48] sm:$0xff] }
   0xb   :  { %834 = vmatpush.bf16.msra.mxu1 %v1486_v9  ;;  %63 = vst [vmem:[#allocation1 + $0x2] ss:$4 sm:$0xff] %v31_v18  ;;  %v35_v30 = vld [vmem:[%s1984_s0 + $0x40] sm:$0xff]  ;;  %v1490_v31 = vld [vmem:[%s1986_s2 + $0x88] sm:$0xff]  ;;  %v37_v33 = vld [vmem:[%s1984_s0 + $0x50] sm:$0xff] }
   0xc   :  { %853 = vmatpush.bf16.msra.mxu2 %v1494_v10  ;;  %v1498_v32 = vld [vmem:[%s1986_s2 + $0xc8] sm:$0xff]  ;;  %v39_v34 = vld [vmem:[%s1984_s0 + $0x60] sm:$0xff]  ;;  %v41_v39 = vld [vmem:[%s1984_s0 + $0x70] sm:$0xff] }
   0xd   :  { %872 = vmatpush.bf16.msra.mxu3 %v1502_v11  ;;  %v1473_v40 = vld [vmem:[%s1986_s2] sm:$0xff]  ;;  %v28_v44 = vld [vmem:[%s1984_s0 + $0x8] sm:$0xff]  ;;  %v30_v45 = vld [vmem:[%s1984_s0 + $0x18] sm:$0xff] }
   0xe   :  { %816 = vmatpush.bf16.msra.mxu0 %v1477_v12  ;;  %v1481_v41 = vld [vmem:[%s1986_s2 + $0x40] sm:$0xff]  ;;  %v32_v46 = vld [vmem:[%s1984_s0 + $0x28] sm:$0xff]  ;;  %v1528_v47 = vld [vmem:[%s1986_s2 + $0x1b8] sm:$0xff]  ;;  %67 = vst [vmem:[#allocation1 + $0x20] ss:$4 sm:$0xff] %v28_v44 }
   0xf   :  { %835 = vmatpush.bf16.msra.mxu1 %v1485_v13  ;;  %v1489_v42 = vld [vmem:[%s1986_s2 + $0x80] sm:$0xff]  ;;  %v1512_v48 = vld [vmem:[%s1986_s2 + $0x138] sm:$0xff]  ;;  %69 = vst [vmem:[#allocation1 + $0x21] ss:$4 sm:$0xff] %v30_v45  ;;  %v1527_v53 = vld [vmem:[%s1986_s2 + $0x1b0] sm:$0xff] }
  0x10   :  { %854 = vmatpush.bf16.msra.mxu2 %v1493_v14  ;;  %v1497_v43 = vld [vmem:[%s1986_s2 + $0xc0] sm:$0xff]  ;;  %v34_v49 = vld [vmem:[%s1984_s0 + $0x38] sm:$0xff]  ;;  %71 = vst [vmem:[#allocation1 + $0x22] ss:$4 sm:$0xff] %v32_v46  ;;  %v1511_v55 = vld [vmem:[%s1986_s2 + $0x130] sm:$0xff] }
  0x11   :  { %873 = vmatpush.bf16.msra.mxu3 %v1501_v15  ;;  %v1520_v50 = vld [vmem:[%s1986_s2 + $0x178] sm:$0xff]  ;;  %73 = vst [vmem:[#allocation1 + $0x23] ss:$4 sm:$0xff] %v34_v49  ;;  %v1519_v56 = vld [vmem:[%s1986_s2 + $0x170] sm:$0xff]  ;;  %v122_v58 = vld [vmem:[%s1985_s1] sm:$0xff] }
  0x12   :  { %817 = vmatpush.bf16.msra.mxu0 %v1476_v20  ;;  %v74_v35 = vld.sshfl [vmem:[#allocation1] sm:$0xff pattern:$0x73625140]  ;;  %v75_v36 = vld.sshfl [vmem:[#allocation1 + $0x8] sm:$0xff pattern:$0x73625140] }
  0x13   :  { %836 = vmatpush.bf16.msra.mxu1 %v1484_v21  ;;  %v76_v37 = vld.sshfl [vmem:[#allocation1 + $0x10] sm:$0xff pattern:$0x73625140]  ;;  %v77_v38 = vld.sshfl [vmem:[#allocation1 + $0x18] sm:$0xff pattern:$0x73625140]  ;;  %v114_v52 = vpack.c.bf16 %v75_v36, %v74_v35 }
  0x14   :  { %855 = vmatpush.bf16.msra.mxu2 %v1492_v22  ;;  %82 = vst [vmem:[#allocation1] ss:$4 sm:$0xff] %v35_v30  ;;  %v1536_v51 = vld [vmem:[%s1986_s2 + $0x1f8] sm:$0xff]  ;;  %v115_v54 = vpack.c.bf16 %v77_v38, %v76_v37  ;;  %v1535_v57 = vld [vmem:[%s1986_s2 + $0x1f0] sm:$0xff]  ;;  %v126_v60 = vld [vmem:[%s1985_s1 + $0x20] sm:$0xff] }
  0x15   :  { %874 = vmatpush.bf16.msra.mxu3 %v1500_v23  ;;  %83 = vst [vmem:[#allocation1 + $0x1] ss:$4 sm:$0xff] %v37_v33  ;;  %v124_v59 = vld [vmem:[%s1985_s1 + $0x10] sm:$0xff]  ;;  %v225_v0 = vunpack.c.l.b16 %v114_v52  ;;  %v226_v1 = vunpack.c.h.b16 %v114_v52  ;;  %v1526_v7 = vld [vmem:[%s1986_s2 + $0x1a8] sm:$0xff]  ;;  %v1525_v20 = vld [vmem:[%s1986_s2 + $0x1a0] sm:$0xff] }
  0x16   :  { %818 = vmatpush.bf16.msra.mxu0 %v1475_v24  ;;  %84 = vst [vmem:[#allocation1 + $0x2] ss:$4 sm:$0xff] %v39_v34  ;;  %v227_v5 = vunpack.c.l.b16 %v115_v54  ;;  %v228_v6 = vunpack.c.h.b16 %v115_v54  ;;  %v1510_v8 = vld [vmem:[%s1986_s2 + $0x128] sm:$0xff]  ;;  %v128_v9 = vld [vmem:[%s1985_s1 + $0x30] sm:$0xff]  ;;  %v1509_v21 = vld [vmem:[%s1986_s2 + $0x120] sm:$0xff] }
  0x17   :  { %837 = vmatpush.bf16.msra.mxu1 %v1483_v25  ;;  %85 = vst [vmem:[#allocation1 + $0x3] ss:$4 sm:$0xff] %v41_v39  ;;  %v1518_v16 = vld [vmem:[%s1986_s2 + $0x168] sm:$0xff]  ;;  %v1517_v22 = vld [vmem:[%s1986_s2 + $0x160] sm:$0xff]  ;;  %v38_v24 = vld [vmem:[%s1984_s0 + $0x58] sm:$0xff] }
  0x18   :  { %856 = vmatpush.bf16.msra.mxu2 %v1491_v26  ;;  %v1534_v17 = vld [vmem:[%s1986_s2 + $0x1e8] sm:$0xff]  ;;  %v1822_v25 = vld.sshfl [vmem:[#allocation1 + $0x20] sm:$0xff pattern:$0x73625140]  ;;  %v1508_v33 = vld [vmem:[%s1986_s2 + $0x118] sm:$0xff] }
  0x19   :  { %875 = vmatpush.bf16.msra.mxu3 %v1499_v27  ;;  %v36_v23 = vld [vmem:[%s1984_s0 + $0x48] sm:$0xff]  ;;  %v1826_v27 = vld.sshfl [vmem:[#allocation1 + $0x30] sm:$0xff pattern:$0x73625140]  ;;  %v134_v34 = vld [vmem:[%s1985_s1 + $0x60] sm:$0xff] }
  0x1a   :  { %819 = vmatpush.bf16.msra.mxu0 %v1474_v28  ;;  %v1824_v26 = vld.sshfl [vmem:[#allocation1 + $0x28] sm:$0xff pattern:$0x73625140]  ;;  %v1533_v28 = vld [vmem:[%s1986_s2 + $0x1e0] sm:$0xff]  ;;  %v1516_v35 = vld [vmem:[%s1986_s2 + $0x158] sm:$0xff] }
  0x1b   :  { %838 = vmatpush.bf16.msra.mxu1 %v1482_v29  ;;  %v130_v29 = vld [vmem:[%s1985_s1 + $0x40] sm:$0xff]  ;;  %v1834_v30 = vld.sshfl [vmem:[#allocation1 + $0x38] sm:$0xff pattern:$0x73625140]  ;;  %v40_v44 = vld [vmem:[%s1984_s0 + $0x68] sm:$0xff] }
  0x1c   :  { %857 = vmatpush.bf16.msra.mxu2 %v1490_v31  ;;  %v132_v31 = vld [vmem:[%s1985_s1 + $0x50] sm:$0xff]  ;;  %86 = vst [vmem:[#allocation1 + $0x20] ss:$4 sm:$0xff] %v36_v23  ;;  %v1532_v36 = vld [vmem:[%s1986_s2 + $0x1d8] sm:$0xff]  ;;  %v1506_v49 = vld [vmem:[%s1986_s2 + $0x108] sm:$0xff] }
  0x1d   :  { %876 = vmatpush.bf16.msra.mxu3 %v1498_v32  ;;  %v1524_v32 = vld [vmem:[%s1986_s2 + $0x198] sm:$0xff]  ;;  %87 = vst [vmem:[#allocation1 + $0x21] ss:$4 sm:$0xff] %v38_v24  ;;  %v1515_v46 = vld [vmem:[%s1986_s2 + $0x150] sm:$0xff]  ;;  %v1530_v52 = vld [vmem:[%s1986_s2 + $0x1c8] sm:$0xff] }
  0x1e   :  { %820 = vmatpush.bf16.msra.mxu0 %v1473_v40  ;;  %v90_v61 = vld.sshfl [vmem:[#allocation1] sm:$0xff pattern:$0x73625140]  ;;  %v91_v62 = vld.sshfl [vmem:[#allocation1 + $0x8] sm:$0xff pattern:$0x73625140] }
  0x1f   :  { %839 = vmatpush.bf16.msra.mxu1 %v1481_v41  ;;  %v118_v63 = vpack.c.bf16 %v91_v62, %v90_v61  ;;  %v92_v2 = vld.sshfl [vmem:[#allocation1 + $0x10] sm:$0xff pattern:$0x73625140]  ;;  %v93_v3 = vld.sshfl [vmem:[#allocation1 + $0x18] sm:$0xff pattern:$0x73625140] }
  0x20   :  { %858 = vmatpush.bf16.msra.mxu2 %v1489_v42  ;;  %v119_v4 = vpack.c.bf16 %v93_v3, %v92_v2  ;;  %154 = vst [vmem:[#allocation1] ss:$4 sm:$0xff] %v122_v58  ;;  %v136_v41 = vld [vmem:[%s1985_s1 + $0x70] sm:$0xff]  ;;  %v42_v45 = vld [vmem:[%s1984_s0 + $0x78] sm:$0xff]  ;;  %v1521_v54 = vld [vmem:[%s1986_s2 + $0x180] sm:$0xff] }
  0x21   :  { %877 = vmatpush.bf16.msra.mxu3 %v1497_v43  ;;  %v233_v10 = vunpack.c.l.b16 %v118_v63  ;;  %v234_v11 = vunpack.c.h.b16 %v118_v63  ;;  %156 = vst [vmem:[#allocation1 + $0x1] ss:$4 sm:$0xff] %v124_v59  ;;  %v1523_v42 = vld [vmem:[%s1986_s2 + $0x190] sm:$0xff]  ;;  %v123_v58 = vld [vmem:[%s1985_s1 + $0x8] sm:$0xff]  ;;  %v125_v61 = vld [vmem:[%s1985_s1 + $0x18] sm:$0xff] }
  0x22   :  { %889 = vmatpush.bf16.msrb.mxu0 %v1512_v48  ;;  %v235_v12 = vunpack.c.l.b16 %v119_v4  ;;  %v236_v13 = vunpack.c.h.b16 %v119_v4  ;;  %158 = vst [vmem:[#allocation1 + $0x2] ss:$4 sm:$0xff] %v126_v60  ;;  %v1507_v43 = vld [vmem:[%s1986_s2 + $0x110] sm:$0xff]  ;;  %v1522_v48 = vld [vmem:[%s1986_s2 + $0x188] sm:$0xff] }
  0x23   :  { %908 = vmatpush.bf16.msrb.mxu1 %v1520_v50  ;;  %v241_v14 = vpack.c.b16 %v233_v10, %v225_v0  ;;  %v242_v15 = vpack.c.b16 %v234_v11, %v226_v1  ;;  %160 = vst [vmem:[#allocation1 + $0x3] ss:$4 sm:$0xff] %v128_v9  ;;  %v127_v3 = vld [vmem:[%s1985_s1 + $0x28] sm:$0xff] }
  0x24   :  { %927 = vmatpush.bf16.msrb.mxu2 %v1528_v47  ;;  %v243_v18 = vpack.c.b16 %v235_v12, %v227_v5  ;;  %v244_v19 = vpack.c.b16 %v236_v13, %v228_v6  ;;  %v1531_v47 = vld [vmem:[%s1986_s2 + $0x1d0] sm:$0xff]  ;;  %88 = vst [vmem:[#allocation1 + $0x22] ss:$4 sm:$0xff] %v40_v44  ;;  %v131_v24 = vld [vmem:[%s1985_s1 + $0x48] sm:$0xff] }
  0x25   :  { %946 = vmatpush.bf16.msrb.mxu3 %v1536_v51  ;;  %821 = vmatmul.bf16.vlgmr.msra.gmra.mxu0 %v241_v14  ;;  %89 = vst [vmem:[#allocation1 + $0x23] ss:$4 sm:$0xff] %v42_v45  ;;  %v1514_v51 = vld [vmem:[%s1986_s2 + $0x148] sm:$0xff] }
  0x26   :  { %890 = vmatpush.bf16.msrb.mxu0 %v1511_v55  ;;  %840 = vmatmul.bf16.vlgmr.msra.gmra.mxu1 %v242_v15  ;;  %v1505_v55 = vld [vmem:[%s1986_s2 + $0x100] sm:$0xff]  ;;  %v129_v15 = vld [vmem:[%s1985_s1 + $0x38] sm:$0xff] }
  0x27   :  { %909 = vmatpush.bf16.msrb.mxu1 %v1519_v56  ;;  %859 = vmatmul.bf16.vlgmr.msra.gmra.mxu2 %v243_v18  ;;  %v1513_v56 = vld [vmem:[%s1986_s2 + $0x140] sm:$0xff] }
  0x28   :  { %928 = vmatpush.bf16.msrb.mxu2 %v1527_v53  ;;  %878 = vmatmul.bf16.vlgmr.msra.gmra.mxu3 %v244_v19 }
  0x29   :  { %947 = vmatpush.bf16.msrb.mxu3 %v1535_v57  ;;  %v1529_v57 = vld [vmem:[%s1986_s2 + $0x1c0] sm:$0xff] }
  0x2a   :  { %891 = vmatpush.bf16.msrb.mxu0 %v1510_v8  ;;  %v169_v37 = vld.sshfl [vmem:[#allocation1] sm:$0xff pattern:$0x73625140]  ;;  %v170_v38 = vld.sshfl [vmem:[#allocation1 + $0x8] sm:$0xff pattern:$0x73625140] }
  0x2b   :  { %910 = vmatpush.bf16.msrb.mxu1 %v1518_v16  ;;  %v171_v39 = vld.sshfl [vmem:[#allocation1 + $0x10] sm:$0xff pattern:$0x73625140]  ;;  %v172_v40 = vld.sshfl [vmem:[#allocation1 + $0x18] sm:$0xff pattern:$0x73625140]  ;;  %v209_v50 = vpack.c.bf16 %v170_v38, %v169_v37 }
  0x2c   :  { %929 = vmatpush.bf16.msrb.mxu2 %v1526_v7  ;;  %177 = vst [vmem:[#allocation1] ss:$4 sm:$0xff] %v130_v29  ;;  %v210_v53 = vpack.c.bf16 %v172_v40, %v171_v39  ;;  %v94_v7 = vld.sshfl [vmem:[#allocation1 + $0x20] sm:$0xff pattern:$0x73625140]  ;;  %v135_v29 = vld [vmem:[%s1985_s1 + $0x68] sm:$0xff] }
  0x2d   :  { %948 = vmatpush.bf16.msrb.mxu3 %v1534_v17  ;;  %178 = vst [vmem:[#allocation1 + $0x1] ss:$4 sm:$0xff] %v132_v31  ;;  %v265_v63 = vunpack.c.l.b16 %v209_v50  ;;  %v266_v0 = vunpack.c.h.b16 %v209_v50  ;;  %v95_v8 = vld.sshfl [vmem:[#allocation1 + $0x28] sm:$0xff pattern:$0x73625140]  ;;  %v137_v39 = vld [vmem:[%s1985_s1 + $0x78] sm:$0xff] }
  0x2e   :  { %892 = vmatpush.bf16.msrb.mxu0 %v1509_v21  ;;  %179 = vst [vmem:[#allocation1 + $0x2] ss:$4 sm:$0xff] %v134_v34  ;;  %v267_v5 = vunpack.c.l.b16 %v210_v53  ;;  %v268_v6 = vunpack.c.h.b16 %v210_v53  ;;  %v96_v11 = vld.sshfl [vmem:[#allocation1 + $0x30] sm:$0xff pattern:$0x73625140]  ;;  %v120_v21 = vpack.c.bf16 %v95_v8, %v94_v7  ;;  %v1541_v7 = vld [vmem:[%s1988_s4 + $0x20] sm:$0xff] }
  0x2f   :  { %911 = vmatpush.bf16.msrb.mxu1 %v1517_v22  ;;  %180 = vst [vmem:[#allocation1 + $0x3] ss:$4 sm:$0xff] %v136_v41  ;;  %v97_v12 = vld.sshfl [vmem:[#allocation1 + $0x38] sm:$0xff pattern:$0x73625140]  ;;  %v117_v22 = vpack.c.bf16 %v1834_v30, %v1826_v27 }
  0x30   :  { %930 = vmatpush.bf16.msrb.mxu2 %v1525_v20  ;;  %162 = vst [vmem:[#allocation1 + $0x20] ss:$4 sm:$0xff] %v123_v58  ;;  %v116_v20 = vpack.c.bf16 %v1824_v26, %v1822_v25  ;;  %v121_v23 = vpack.c.bf16 %v97_v12, %v96_v11  ;;  %v237_v26 = vunpack.c.l.b16 %v120_v21  ;;  %v238_v34 = vunpack.c.h.b16 %v120_v21  ;;  %v1540_v11 = vld [vmem:[%s1988_s4 + $0x18] sm:$0xff]  ;;  %v1551_v12 = vld [vmem:[%s1989_s5 + $0x30] sm:$0xff]  ;;  %v1537_v21 = vld [vmem:[%s1988_s4] sm:$0xff] }
  0x31   :  { %949 = vmatpush.bf16.msrb.mxu3 %v1533_v28  ;;  %164 = vst [vmem:[#allocation1 + $0x21] ss:$4 sm:$0xff] %v125_v61  ;;  %v133_v28 = vld [vmem:[%s1985_s1 + $0x58] sm:$0xff]  ;;  %v232_v37 = vunpack.c.h.b16 %v117_v22 }
  0x32   :  { %893 = vmatpush.bf16.msrb.mxu0 %v1508_v33  ;;  %166 = vst [vmem:[#allocation1 + $0x22] ss:$4 sm:$0xff] %v127_v3  ;;  %v229_v25 = vunpack.c.l.b16 %v116_v20  ;;  %v230_v33 = vunpack.c.h.b16 %v116_v20  ;;  %v240_v38 = vunpack.c.h.b16 %v121_v23  ;;  %v1549_v20 = vld [vmem:[%s1989_s5 + $0x20] sm:$0xff] }
  0x33   :  { %912 = vmatpush.bf16.msrb.mxu1 %v1516_v35  ;;  %168 = vst [vmem:[#allocation1 + $0x23] ss:$4 sm:$0xff] %v129_v15  ;;  %v231_v35 = vunpack.c.l.b16 %v117_v22  ;;  %v1556_v22 = vld [vmem:[%s1987_s3] ss:$0 sm:$0xff] }
  0x34   :  { %931 = vmatpush.bf16.msrb.mxu2 %v1524_v32  ;;  %v245_v40 = vpack.c.b16 %v237_v26, %v229_v25  ;;  %v246_v41 = vpack.c.b16 %v238_v34, %v230_v33  ;;  %v1547_v25 = vld [vmem:[%s1989_s5 + $0x10] sm:$0xff] }
  0x35   :  { %950 = vmatpush.bf16.msrb.mxu3 %v1532_v36  ;;  %v239_v36 = vunpack.c.l.b16 %v121_v23 }
  0x36   :  { %894 = vmatpush.bf16.msrb.mxu0 %v1507_v43  ;;  %v185_v59 = vld.sshfl [vmem:[#allocation1] sm:$0xff pattern:$0x73625140]  ;;  %v186_v60 = vld.sshfl [vmem:[#allocation1 + $0x8] sm:$0xff pattern:$0x73625140]  ;;  %v248_v43 = vpack.c.b16 %v240_v38, %v232_v37 }
  0x37   :  { %913 = vmatpush.bf16.msrb.mxu1 %v1515_v46  ;;  %v213_v62 = vpack.c.bf16 %v186_v60, %v185_v59  ;;  %v187_v1 = vld.sshfl [vmem:[#allocation1 + $0x10] sm:$0xff pattern:$0x73625140]  ;;  %v188_v2 = vld.sshfl [vmem:[#allocation1 + $0x18] sm:$0xff pattern:$0x73625140] }
  0x38   :  { %932 = vmatpush.bf16.msrb.mxu2 %v1523_v42  ;;  %v214_v4 = vpack.c.bf16 %v188_v2, %v187_v1  ;;  %v247_v42 = vpack.c.b16 %v239_v36, %v231_v35  ;;  %v1543_v1 = vld [vmem:[%s1988_s4 + $0x30] sm:$0xff] }
  0x39   :  { %951 = vmatpush.bf16.msrb.mxu3 %v1531_v47  ;;  %v273_v9 = vunpack.c.l.b16 %v213_v62  ;;  %v274_v10 = vunpack.c.h.b16 %v213_v62 }
  0x3a   :  { %895 = vmatpush.bf16.msrb.mxu0 %v1506_v49  ;;  %v275_v13 = vunpack.c.l.b16 %v214_v4  ;;  %v276_v14 = vunpack.c.h.b16 %v214_v4  ;;  %v173_v31 = vld.sshfl [vmem:[#allocation1 + $0x20] sm:$0xff pattern:$0x73625140]  ;;  %v174_v32 = vld.sshfl [vmem:[#allocation1 + $0x28] sm:$0xff pattern:$0x73625140] }
  0x3b   :  { %914 = vmatpush.bf16.msrb.mxu1 %v1514_v51  ;;  %v281_v16 = vpack.c.b16 %v273_v9, %v265_v63  ;;  %v282_v17 = vpack.c.b16 %v274_v10, %v266_v0  ;;  %v175_v27 = vld.sshfl [vmem:[#allocation1 + $0x30] sm:$0xff pattern:$0x73625140]  ;;  %v176_v30 = vld.sshfl [vmem:[#allocation1 + $0x38] sm:$0xff pattern:$0x73625140]  ;;  %v211_v46 = vpack.c.bf16 %v174_v32, %v173_v31 }
  0x3c   :  { %933 = vmatpush.bf16.msrb.mxu2 %v1522_v48  ;;  %v283_v18 = vpack.c.b16 %v275_v13, %v267_v5  ;;  %v284_v19 = vpack.c.b16 %v276_v14, %v268_v6  ;;  %181 = vst [vmem:[#allocation1 + $0x20] ss:$4 sm:$0xff] %v131_v24  ;;  %v212_v50 = vpack.c.bf16 %v176_v30, %v175_v27  ;;  %v1544_v0 = vld [vmem:[%s1988_s4 + $0x38] sm:$0xff]  ;;  %v1542_v4 = vld [vmem:[%s1988_s4 + $0x28] sm:$0xff]  ;;  %v1539_v13 = vld [vmem:[%s1988_s4 + $0x10] sm:$0xff] }
  0x3d   :  { %952 = vmatpush.bf16.msrb.mxu3 %v1530_v52  ;;  %826 = vmatmul.bf16.gmra.mxu0 %v281_v16  ;;  %182 = vst [vmem:[#allocation1 + $0x21] ss:$4 sm:$0xff] %v133_v28  ;;  %v269_v52 = vunpack.c.l.b16 %v211_v46  ;;  %v1552_v10 = vld [vmem:[%s1989_s5 + $0x38] sm:$0xff]  ;;  %v1550_v16 = vld [vmem:[%s1989_s5 + $0x28] sm:$0xff] }
  0x3e   :  { %896 = vmatpush.bf16.msrb.mxu0 %v1505_v55  ;;  %845 = vmatmul.bf16.gmra.mxu1 %v282_v17  ;;  %183 = vst [vmem:[#allocation1 + $0x22] ss:$4 sm:$0xff] %v135_v29  ;;  %v272_v58 = vunpack.c.h.b16 %v212_v50  ;;  %v1538_v17 = vld [vmem:[%s1988_s4 + $0x8] sm:$0xff]  ;;  %v1548_v28 = vld [vmem:[%s1989_s5 + $0x18] sm:$0xff] }
  0x3f   :  { %915 = vmatpush.bf16.msrb.mxu1 %v1513_v56  ;;  %864 = vmatmul.bf16.gmra.mxu2 %v283_v18  ;;  %184 = vst [vmem:[#allocation1 + $0x23] ss:$4 sm:$0xff] %v137_v39  ;;  %v271_v56 = vunpack.c.l.b16 %v212_v50  ;;  %v1546_v30 = vld [vmem:[%s1989_s5 + $0x8] sm:$0xff]  ;;  %v1545_v39 = vld [vmem:[%s1989_s5] sm:$0xff] }
  0x40   :  { %934 = vmatpush.bf16.msrb.mxu2 %v1521_v54  ;;  %883 = vmatmul.bf16.gmra.mxu3 %v284_v19  ;;  %v270_v54 = vunpack.c.h.b16 %v211_v46 }
  0x41   :  { %953 = vmatpush.bf16.msrb.mxu3 %v1529_v57 }
  0x42   :  { %1051 = vmatpush.bf16.msra.mxu0 %v1552_v10 }
  0x43   :  { %1113 = vmatpush.bf16.msra.mxu1 %v1544_v0 }
  0x46   :  { %v189_v44 = vld.sshfl [vmem:[#allocation1 + $0x20] sm:$0xff pattern:$0x73625140]  ;;  %v190_v45 = vld.sshfl [vmem:[#allocation1 + $0x28] sm:$0xff pattern:$0x73625140]  ;;  %1052 = vmatpush.bf16.msra.mxu0 %v1551_v12 }
  0x47   :  { %v215_v47 = vpack.c.bf16 %v190_v45, %v189_v44  ;;  %v191_v48 = vld.sshfl [vmem:[#allocation1 + $0x30] sm:$0xff pattern:$0x73625140]  ;;  %v192_v49 = vld.sshfl [vmem:[#allocation1 + $0x38] sm:$0xff pattern:$0x73625140]  ;;  %1114 = vmatpush.bf16.msra.mxu1 %v1543_v1 }
  0x48   :  { %v216_v51 = vpack.c.bf16 %v192_v49, %v191_v48 }
  0x49   :  { %v277_v53 = vunpack.c.l.b16 %v215_v47  ;;  %v278_v55 = vunpack.c.h.b16 %v215_v47 }
  0x4a   :  { %v279_v57 = vunpack.c.l.b16 %v216_v51  ;;  %v280_v59 = vunpack.c.h.b16 %v216_v51  ;;  %1053 = vmatpush.bf16.msra.mxu0 %v1550_v16 }
  0x4b   :  { %v285_v60 = vpack.c.b16 %v277_v53, %v269_v52  ;;  %v286_v61 = vpack.c.b16 %v278_v55, %v270_v54  ;;  %1115 = vmatpush.bf16.msra.mxu1 %v1542_v4 }
  0x4c   :  { %v287_v62 = vpack.c.b16 %v279_v57, %v271_v56  ;;  %v288_v63 = vpack.c.b16 %v280_v59, %v272_v58 }
  0x4d   :  { %897 = vmatmul.bf16.vlgmr.msrb.gmra.mxu0 %v245_v40 }
  0x4e   :  { %916 = vmatmul.bf16.vlgmr.msrb.gmra.mxu1 %v246_v41  ;;  %1054 = vmatpush.bf16.msra.mxu0 %v1549_v20 }
  0x4f   :  { %935 = vmatmul.bf16.vlgmr.msrb.gmra.mxu2 %v247_v42  ;;  %1116 = vmatpush.bf16.msra.mxu1 %v1541_v7 }
  0x50   :  { %954 = vmatmul.bf16.vlgmr.msrb.gmra.mxu3 %v248_v43 }
  0x52   :  { %1055 = vmatpush.bf16.msra.mxu0 %v1548_v28 }
  0x53   :  { %1117 = vmatpush.bf16.msra.mxu1 %v1540_v11 }
  0x56   :  { %1056 = vmatpush.bf16.msra.mxu0 %v1547_v25 }
  0x57   :  { %1118 = vmatpush.bf16.msra.mxu1 %v1539_v13 }
  0x5a   :  { %1057 = vmatpush.bf16.msra.mxu0 %v1546_v30 }
  0x5b   :  { %1119 = vmatpush.bf16.msra.mxu1 %v1538_v17 }
  0x5d   :  { %902 = vmatmul.bf16.gmra.mxu0 %v285_v60 }
  0x5e   :  { %921 = vmatmul.bf16.gmra.mxu1 %v286_v61  ;;  %1058 = vmatpush.bf16.msra.mxu0 %v1545_v39 }
  0x5f   :  { %940 = vmatmul.bf16.gmra.mxu2 %v287_v62  ;;  %1120 = vmatpush.bf16.msra.mxu1 %v1537_v21 }
  0x60   :  { %959 = vmatmul.bf16.gmra.mxu3 %v288_v63 }
  0xa2   :  { %v822_v2 = vpop.f32.mrf.mxu0 }
  0xa3   :  { %v841_v3 = vpop.f32.mrf.mxu1  ;;  %v823_v29 = vadd.f32 %v1556_v22, %v822_v2 }
  0xa5   :  { %v842_v26 = vadd.f32 %v841_v3, %v823_v29 }
  0xaa   :  { %v860_v5 = vpop.f32.mrf.mxu2  ;;  %v824_v8 = vpop.f32.mrf.mxu0 }
  0xab   :  { %v879_v6 = vpop.f32.mrf.mxu3  ;;  %v843_v9 = vpop.f32.mrf.mxu1  ;;  %v825_v33 = vadd.f32 %v1556_v22, %v824_v8  ;;  %v861_v35 = vadd.f32 %v860_v5, %v842_v26 }
  0xad   :  { %v844_v38 = vadd.f32 %v843_v9, %v825_v33  ;;  %v880_v40 = vadd.f32 %v879_v6, %v861_v35 }
  0xb2   :  { %v862_v14 = vpop.f32.mrf.mxu2 }
  0xb3   :  { %v881_v15 = vpop.f32.mrf.mxu3  ;;  %v863_v41 = vadd.f32 %v862_v14, %v844_v38 }
  0xb5   :  { %v882_v45 = vadd.f32 %v881_v15, %v863_v41 }
  0xba   :  { %v827_v18 = vpop.f32.mrf.mxu0 }
  0xbb   :  { %v846_v19 = vpop.f32.mrf.mxu1  ;;  %v828_v46 = vadd.f32 %v1556_v22, %v827_v18 }
  0xbd   :  { %v847_v51 = vadd.f32 %v846_v19, %v828_v46 }
  0xc2   :  { %v865_v23 = vpop.f32.mrf.mxu2  ;;  %v829_v31 = vpop.f32.mrf.mxu0 }
  0xc3   :  { %v884_v24 = vpop.f32.mrf.mxu3  ;;  %v848_v32 = vpop.f32.mrf.mxu1  ;;  %v830_v53 = vadd.f32 %v1556_v22, %v829_v31  ;;  %v866_v57 = vadd.f32 %v865_v23, %v847_v51 }
  0xc5   :  { %v849_v61 = vadd.f32 %v848_v32, %v830_v53  ;;  %v885_v0 = vadd.f32 %v884_v24, %v866_v57  ;;  %v1557_v24 = vld [vmem:[%s1990_s6] ss:$0 sm:$0xff] }
  0xca   :  { %v867_v34 = vpop.f32.mrf.mxu2  ;;  %v898_v36 = vpop.f32.mrf.mxu0 }
  0xcb   :  { %v886_v27 = vpop.f32.mrf.mxu3  ;;  %v917_v37 = vpop.f32.mrf.mxu1  ;;  %v899_v42 = vadd.f32 %v898_v36, %v880_v40  ;;  %v868_v1 = vadd.f32 %v867_v34, %v849_v61 }
  0xcd   :  { %v918_v49 = vadd.f32 %v917_v37, %v899_v42  ;;  %v887_v8 = vadd.f32 %v886_v27, %v868_v1 }
  0xd2   :  { %v936_v43 = vpop.f32.mrf.mxu2  ;;  %v900_v47 = vpop.f32.mrf.mxu0 }
  0xd3   :  { %v955_v44 = vpop.f32.mrf.mxu3  ;;  %v919_v48 = vpop.f32.mrf.mxu1  ;;  %v901_v50 = vadd.f32 %v900_v47, %v882_v45  ;;  %v937_v52 = vadd.f32 %v936_v43, %v918_v49 }
  0xd5   :  { %v920_v54 = vadd.f32 %v919_v48, %v901_v50  ;;  %v956_v58 = vadd.f32 %v955_v44, %v937_v52 }
  0xd7   :  { %v965_v2 = vmax.f32 %v956_v58, 0.0 }
  0xda   :  { %v938_v55 = vpop.f32.mrf.mxu2  ;;  %v903_v60 = vpop.f32.mrf.mxu0 }
  0xdb   :  { %v957_v56 = vpop.f32.mrf.mxu3  ;;  %v939_v59 = vadd.f32 %v938_v55, %v920_v54  ;;  %v922_v63 = vpop.f32.mrf.mxu1  ;;  %v904_v5 = vadd.f32 %v903_v60, %v885_v0 }
  0xdd   :  { %v958_v62 = vadd.f32 %v957_v56, %v939_v59  ;;  %v923_v10 = vadd.f32 %v922_v63, %v904_v5 }
  0xdf   :  { %v966_v3 = vmax.f32 %v958_v62, 0.0 }
  0xe1   :  { %v969_v4 = vpack.c.bf16 %v966_v3, %v965_v2 }
  0xe2   :  { %v941_v6 = vpop.f32.mrf.mxu2  ;;  %v905_v9 = vpop.f32.mrf.mxu0 }
  0xe3   :  { %v960_v7 = vpop.f32.mrf.mxu3  ;;  %1121 = vmatmul.bf16.vlgmr.msra.gmra.mxu1 %v969_v4  ;;  %v906_v11 = vadd.f32 %v905_v9, %v887_v8  ;;  %v942_v12 = vadd.f32 %v941_v6, %v923_v10  ;;  %v924_v13 = vpop.f32.mrf.mxu1 }
  0xe5   :  { %v925_v14 = vadd.f32 %v924_v13, %v906_v11  ;;  %v961_v16 = vadd.f32 %v960_v7, %v942_v12 }
  0xe7   :  { %v967_v20 = vmax.f32 %v961_v16, 0.0 }
  0xea   :  { %v943_v15 = vpop.f32.mrf.mxu2 }
  0xeb   :  { %v944_v17 = vadd.f32 %v943_v15, %v925_v14  ;;  %v962_v18 = vpop.f32.mrf.mxu3 }
  0xed   :  { %v963_v19 = vadd.f32 %v962_v18, %v944_v17 }
  0xef   :  { %v968_v21 = vmax.f32 %v963_v19, 0.0 }
  0xf1   :  { %v970_v22 = vpack.c.bf16 %v968_v21, %v967_v20 }
  0xf3   :  { %1059 = vmatmul.bf16.vlgmr.msra.gmra.mxu0 %v970_v22 }
 0x160   :  { %v1122_v23 = vpop.f32.mrf.mxu1 }
 0x168   :  { %v1124_v32 = vpop.f32.mrf.mxu1 }
 0x170   :  { %v1060_v28 = vpop.f32.mrf.mxu0 }
 0x171   :  { %v1123_v29 = vadd.f32 %v1122_v23, %v1060_v28 }
 0x173   :  { %v1131_v31 = vadd.f32 %v1557_v24, %v1123_v29 }
 0x175   :  { %1133 = vst [vmem:[#allocation2] sm:$0xff] %v1131_v31 }
 0x178   :  { %v1062_v25 = vpop.f32.mrf.mxu0 }
 0x179   :  { %v1125_v26 = vadd.f32 %v1124_v32, %v1062_v25 }
 0x17b   :  { %v1132_v33 = vadd.f32 %v1557_v24, %v1125_v26 }
 0x17d   :  { %1134 = vst [vmem:[#allocation2 + $0x8] sm:$0xff] %v1132_v33 }
 0x17e   :  { %1138 = vsyncadd [#allocation3], 224  ;;  %s1141_s14 = sshll.u32 %s1991_s7, 4  ;;  %s1584_s15 = smov [#allocation2]   ;;  %s1142_s14 = int_to_ptr.hbm [resolvable:$true] %s1141_s14 }
 0x17f   :  { %s1139_s16 = sshll.u32 %s1584_s15, 4  ;;  %s1585_s17 = smov 32   ;;  %s1140_s16 = int_to_ptr.vmem [resolvable:$true] %s1139_s16 }
 0x180   :  { %s1586_s6 = smov 2  }
 0x181   :  { %1147 = dma.vmem_to_hbm [thread:$0]  %s1140_s16, 32, %s1142_s14, [#allocation3], %s1585_s17, %s1585_s17, %s1586_s6  }
 0x182   :  { %1582 = dma.done.wait [#allocation3], 256  }
 0x183   :  { %1583 = vsyncadd [#allocation3], 4294967040 }
 0x184   :  { %1152 = vsyncpa [#allocation3], 1 }

</bundles_post_ra>
